<compile_context>
chip_gen: v5e
topology: v5e:2x2
jax: 0.10.0
libtpu: 0.0.40
codegen_flags: <defaults>
</compile_context>

<pallas_src>
import jax
import jax.numpy as jnp
from jax import lax
from jax.experimental import pallas as pl
from jax.experimental.pallas import tpu as pltpu

EPS = 1e-9


def _layernorm_kernel(x_ref, g_ref, b_ref, o_ref):
    """Unpacked path: one logical row per block row; normalize over last axis."""
    x = x_ref[...]
    if x.dtype != jnp.float32:
        x = x.astype(jnp.float32)
    d = x.shape[-1]
    # Single pass over x for both moments (no mean -> center -> var chain).
    s1 = jnp.sum(x, axis=-1, keepdims=True)
    s2 = jnp.sum(x * x, axis=-1, keepdims=True)
    mean = s1 * (1.0 / d)
    var = jnp.maximum(s2 - s1 * mean, 0.0) * (1.0 / (d - 1))  # unbiased (ddof=1)
    inv = 1.0 / (jnp.sqrt(var) + EPS)                         # eps added to std
    o_ref[...] = (g_ref[...] * ((x - mean) * inv) + b_ref[...]).astype(o_ref.dtype)


def _layernorm_packed_kernel(x_ref, g_ref, b_ref, seg_ref, segt_ref, o_ref):
    """Packed path: each block row holds G logical rows of width D (G*D = 128),
    so every load/store is lane-dense.  Group sums and the broadcast back to
    full width use tiny exact MXU matmuls against a 0/1 segment matrix."""
    x = x_ref[...]
    if x.dtype != jnp.float32:
        x = x.astype(jnp.float32)
    gd, ng = seg_ref.shape
    d = gd // ng
    seg = seg_ref[...]       # (G*D, G) membership matrix
    segt = segt_ref[...]     # (G, G*D)
    hi = lax.Precision.HIGHEST  # exact f32 sums / broadcasts on the MXU
    s1 = jnp.dot(x, seg, precision=hi, preferred_element_type=jnp.float32)      # (tm, G)
    s2 = jnp.dot(x * x, seg, precision=hi, preferred_element_type=jnp.float32)  # (tm, G)
    mean = s1 * (1.0 / d)
    var = jnp.maximum(s2 - s1 * mean, 0.0) * (1.0 / (d - 1))
    inv = 1.0 / (jnp.sqrt(var) + EPS)
    mean_f = jnp.dot(mean, segt, precision=hi, preferred_element_type=jnp.float32)
    inv_f = jnp.dot(inv, segt, precision=hi, preferred_element_type=jnp.float32)
    o_ref[...] = (g_ref[...] * ((x - mean_f) * inv_f) + b_ref[...]).astype(o_ref.dtype)


def _choose_tiling(m_rows, row_width, itemsize, tm=None):
    """Pick the row tile and a generation-aware scoped-VMEM limit."""
    try:
        vmem_cap = int(pltpu.get_tpu_info().vmem_capacity_bytes)
    except Exception:
        vmem_cap = 64 * 1024 * 1024  # conservative: v7x per-TensorCore VMEM

    if tm is None:
        # HBM-bound: a few-MiB input slab per step already sits near the HBM
        # roofline; bigger tiles only burn VMEM (tight on v7x's 64 MiB).
        target_in_bytes = 4 * 1024 * 1024
        tm = max(8, (target_in_bytes // (row_width * itemsize)) // 8 * 8)
        # Keep >= ~8 grid steps so v7x's 2 TensorCores both get work and the
        # double-buffered pipeline has something to overlap with.
        tm = min(tm, max(8, (-(-m_rows // 8) + 7) // 8 * 8))
    else:
        tm = max(8, int(tm) - int(tm) % 8)

    if m_rows < 8:
        tm = m_rows  # full-extent block (allowed: equals the array dim)

    # Scoped-VMEM request: double-buffered input + output windows plus f32
    # compute slabs, capped at 75% of this generation's physical VMEM.
    step_bytes = tm * row_width * (2 * 2 * itemsize + 2 * 4)
    vmem_limit = int(step_bytes * 1.5) + (4 << 20)
    vmem_limit = max(vmem_limit, 16 * 1024 * 1024)
    vmem_limit = min(vmem_limit, vmem_cap * 3 // 4)
    return tm, vmem_limit


def _run_unpacked(x2, g32, b32, tm, vmem_limit):
    M, D = x2.shape
    grid = (pl.cdiv(M, tm),)  # partial last block: loads padded, stores clipped
    return pl.pallas_call(
        _layernorm_kernel,
        out_shape=jax.ShapeDtypeStruct((M, D), x2.dtype),
        grid_spec=pltpu.PrefetchScalarGridSpec(
            num_scalar_prefetch=0,
            grid=grid,
            in_specs=[
                pl.BlockSpec((tm, D), lambda i: (i, 0)),
                pl.BlockSpec((1, D), lambda i: (0, 0)),
                pl.BlockSpec((1, D), lambda i: (0, 0)),
            ],
            out_specs=pl.BlockSpec((tm, D), lambda i: (i, 0)),
        ),
        compiler_params=pltpu.CompilerParams(
            dimension_semantics=("parallel",),
            vmem_limit_bytes=vmem_limit,
        ),
    )(x2, g32, b32)


def _run_packed(xk, gk, bk, seg, segt, tm, vmem_limit):
    mr, rw = xk.shape
    ng = seg.shape[1]
    grid = (pl.cdiv(mr, tm),)
    return pl.pallas_call(
        _layernorm_packed_kernel,
        out_shape=jax.ShapeDtypeStruct((mr, rw), xk.dtype),
        grid_spec=pltpu.PrefetchScalarGridSpec(
            num_scalar_prefetch=0,
            grid=grid,
            in_specs=[
                pl.BlockSpec((tm, rw), lambda i: (i, 0)),
                pl.BlockSpec((1, rw), lambda i: (0, 0)),
                pl.BlockSpec((1, rw), lambda i: (0, 0)),
                pl.BlockSpec((rw, ng), lambda i: (0, 0)),
                pl.BlockSpec((ng, rw), lambda i: (0, 0)),
            ],
            out_specs=pl.BlockSpec((tm, rw), lambda i: (i, 0)),
        ),
        compiler_params=pltpu.CompilerParams(
            dimension_semantics=("parallel",),
            vmem_limit_bytes=vmem_limit,
        ),
    )(xk, gk, bk, seg, segt)


def layer_norm(x, gamma, beta, *, tm=None):
    """x: (..., D); gamma, beta: (D,). Returns same shape/dtype as x."""
    orig_shape = x.shape
    D = orig_shape[-1]
    assert D > 1, "LayerNorm with ddof=1 std requires embed_dim > 1"
    x2 = x.reshape(-1, D)
    M = x2.shape[0]
    itemsize = x2.dtype.itemsize

    # Tiny (D,) params: cast to f32 once here instead of once per grid step.
    g32 = gamma.astype(jnp.float32).reshape(1, D)
    b32 = beta.astype(jnp.float32).reshape(1, D)

    # Lane-dense packing for small D that divides 128 (demo D=32).
    G = 128 // D if (D < 128 and 128 % D == 0) else 1
    if G > 1 and M % G == 0:
        m_rows, row_w = M // G, G * D
        xk = x2.reshape(m_rows, row_w)   # contiguous row-major reshape: free
        gk = jnp.tile(g32, (1, G))
        bk = jnp.tile(b32, (1, G))
        col = jnp.arange(row_w, dtype=jnp.int32) // D
        seg = (col[:, None] == jnp.arange(G, dtype=jnp.int32)[None, :]).astype(jnp.float32)
        segt = seg.T
        tm_, vmem_limit = _choose_tiling(m_rows, row_w, itemsize, tm)
        out = _run_packed(xk, gk, bk, seg, segt, tm_, vmem_limit).reshape(M, D)
    else:
        # TODO(synk): D not a multiple of 128 (or rows not divisible by the
        # packing factor) falls back to masked vst.msk stores; correct but not
        # lane-dense.
        tm_, vmem_limit = _choose_tiling(M, D, itemsize, tm)
        out = _run_unpacked(x2, g32, b32, tm_, vmem_limit)

    return out.reshape(orig_shape)


def _ref_layer_norm(x, gamma, beta):
    # pure-JAX reference mirroring the PyTorch forward exactly
    mean = jnp.mean(x, axis=-1, keepdims=True)
    std = jnp.std(x, axis=-1, keepdims=True, ddof=1)
    return gamma * ((x - mean) / (std + EPS)) + beta


if __name__ == "__main__":
    key = jax.random.PRNGKey(0)
    k1, k2, k3, k4, kg, kb = jax.random.split(key, 6)

    # Shapes implied by the module: batch=2, seq=8, embed_dim=32.
    batch, seq, embed_dim = 2, 8, 32
    x = jax.random.normal(k1, (batch, seq, embed_dim), dtype=jnp.float32)
    gamma = jnp.ones((embed_dim,), dtype=jnp.float32)   # nn.Parameter(torch.ones)
    beta = jnp.zeros((embed_dim,), dtype=jnp.float32)   # nn.Parameter(torch.zeros)

    out = jax.block_until_ready(layer_norm(x, gamma, beta))
    ref = _ref_layer_norm(x, gamma, beta)
    assert out.shape == x.shape and out.dtype == x.dtype
    assert jnp.allclose(out, ref, atol=1e-5, rtol=1e-5)

    # Larger row count: multi-step grid through the packed (lane-dense) path.
    g_r = jax.random.normal(kg, (embed_dim,), dtype=jnp.float32)
    b_r = jax.random.normal(kb, (embed_dim,), dtype=jnp.float32)
    x_big = jax.random.normal(k2, (4, 64, embed_dim), dtype=jnp.float32)
    out_big = jax.block_until_ready(layer_norm(x_big, g_r, b_r))
    assert jnp.allclose(out_big, _ref_layer_norm(x_big, g_r, b_r), atol=1e-5, rtol=1e-5)

    # Row count not divisible by the packing factor: unpacked fallback with a
    # partial last block (cdiv grid, clipped stores).
    x_odd = jax.random.normal(k3, (3, 7, embed_dim), dtype=jnp.float32)
    out_odd = jax.block_until_ready(layer_norm(x_odd, gamma, beta, tm=8))
    assert jnp.allclose(out_odd, _ref_layer_norm(x_odd, gamma, beta),
                        atol=1e-5, rtol=1e-5)

    # D that is already a multiple of 128: lane-dense unpacked path.
    d128 = 128
    x128 = jax.random.normal(k4, (2, 8, d128), dtype=jnp.float32)
    g128 = jax.random.normal(kg, (d128,), dtype=jnp.float32)
    b128 = jax.random.normal(kb, (d128,), dtype=jnp.float32)
    out128 = jax.block_until_ready(layer_norm(x128, g128, b128))
    assert jnp.allclose(out128, _ref_layer_norm(x128, g128, b128),
                        atol=1e-5, rtol=1e-5)

    print("KERNEL_OK")
</pallas_src>

<mosaic_0001>
module attributes {stable_mosaic.version = 11 : i64} {
  func.func @_layernorm_packed_kernel(%arg0: i32, %arg1: memref<4x128xf32, #tpu.memory_space<vmem>>, %arg2: memref<1x128xf32, #tpu.memory_space<vmem>>, %arg3: memref<1x128xf32, #tpu.memory_space<vmem>>, %arg4: memref<128x4xf32, #tpu.memory_space<vmem>>, %arg5: memref<4x128xf32, #tpu.memory_space<vmem>>, %arg6: memref<4x128xf32, #tpu.memory_space<vmem>>) attributes {dimension_semantics = [#tpu.dimension_semantics<parallel>], iteration_bounds = array<i64: 1>, scalar_prefetch = 0 : i64, scratch_operands = 0 : i64, tpu.core_type = #tpu.core_type<tc>, window_params = [{transform_indices = @transform_0, window_bounds = array<i64: 4, 128>}, {pipeline_mode = #tpu.pipeline_mode<synchronous>, transform_indices = @transform_1, window_bounds = array<i64: 1, 128>}, {pipeline_mode = #tpu.pipeline_mode<synchronous>, transform_indices = @transform_2, window_bounds = array<i64: 1, 128>}, {pipeline_mode = #tpu.pipeline_mode<synchronous>, transform_indices = @transform_3, window_bounds = array<i64: 128, 4>}, {pipeline_mode = #tpu.pipeline_mode<synchronous>, transform_indices = @transform_4, window_bounds = array<i64: 4, 128>}, {transform_indices = @transform_5, window_bounds = array<i64: 4, 128>}]} {
    %c0 = arith.constant 0 : index
    %c0_0 = arith.constant 0 : index
    %0 = vector.load %arg1[%c0, %c0_0] : memref<4x128xf32, #tpu.memory_space<vmem>>, vector<4x128xf32>
    %c0_1 = arith.constant 0 : index
    %c0_2 = arith.constant 0 : index
    %1 = vector.load %arg4[%c0_1, %c0_2] : memref<128x4xf32, #tpu.memory_space<vmem>>, vector<128x4xf32>
    %c0_3 = arith.constant 0 : index
    %c0_4 = arith.constant 0 : index
    %2 = vector.load %arg5[%c0_3, %c0_4] : memref<4x128xf32, #tpu.memory_space<vmem>>, vector<4x128xf32>
    %cst = arith.constant dense<0.000000e+00> : vector<4x4xf32>
    %3 = tpu.matmul %0, %1, %cst {dimension_numbers = #tpu.dot_dimension_numbers<[1], [0], [0], [1], [0, 0, 1, 1], [], []>, precision = #tpu.contract_precision<fp32>} : vector<4x128xf32>, vector<128x4xf32>, vector<4x4xf32> -> vector<4x4xf32>
    %4 = arith.mulf %0, %0 : vector<4x128xf32>
    %cst_5 = arith.constant dense<0.000000e+00> : vector<4x4xf32>
    %5 = tpu.matmul %4, %1, %cst_5 {dimension_numbers = #tpu.dot_dimension_numbers<[1], [0], [0], [1], [0, 0, 1, 1], [], []>, precision = #tpu.contract_precision<fp32>} : vector<4x128xf32>, vector<128x4xf32>, vector<4x4xf32> -> vector<4x4xf32>
    %cst_6 = arith.constant 3.125000e-02 : f32
    %6 = vector.broadcast %cst_6 : f32 to vector<4x4xf32>
    %7 = arith.mulf %3, %6 : vector<4x4xf32>
    %8 = arith.mulf %3, %7 : vector<4x4xf32>
    %9 = arith.subf %5, %8 : vector<4x4xf32>
    %cst_7 = arith.constant 0.000000e+00 : f32
    %10 = vector.broadcast %cst_7 : f32 to vector<4x4xf32>
    %11 = arith.maximumf %9, %10 : vector<4x4xf32>
    %cst_8 = arith.constant 0.0322580636 : f32
    %12 = vector.broadcast %cst_8 : f32 to vector<4x4xf32>
    %13 = arith.mulf %11, %12 : vector<4x4xf32>
    %14 = math.sqrt %13 : vector<4x4xf32>
    %cst_9 = arith.constant 9.99999971E-10 : f32
    %15 = vector.broadcast %cst_9 : f32 to vector<4x4xf32>
    %16 = arith.addf %14, %15 : vector<4x4xf32>
    %cst_10 = arith.constant 1.000000e+00 : f32
    %17 = vector.broadcast %cst_10 : f32 to vector<4x4xf32>
    %18 = arith.divf %17, %16 : vector<4x4xf32>
    %cst_11 = arith.constant dense<0.000000e+00> : vector<4x128xf32>
    %19 = tpu.matmul %7, %2, %cst_11 {dimension_numbers = #tpu.dot_dimension_numbers<[1], [0], [0], [1], [0, 0, 1, 1], [], []>, precision = #tpu.contract_precision<fp32>} : vector<4x4xf32>, vector<4x128xf32>, vector<4x128xf32> -> vector<4x128xf32>
    %cst_12 = arith.constant dense<0.000000e+00> : vector<4x128xf32>
    %20 = tpu.matmul %18, %2, %cst_12 {dimension_numbers = #tpu.dot_dimension_numbers<[1], [0], [0], [1], [0, 0, 1, 1], [], []>, precision = #tpu.contract_precision<fp32>} : vector<4x4xf32>, vector<4x128xf32>, vector<4x128xf32> -> vector<4x128xf32>
    %c0_13 = arith.constant 0 : index
    %c0_14 = arith.constant 0 : index
    %21 = vector.load %arg2[%c0_13, %c0_14] : memref<1x128xf32, #tpu.memory_space<vmem>>, vector<1x128xf32>
    %22 = arith.subf %0, %19 : vector<4x128xf32>
    %23 = arith.mulf %22, %20 : vector<4x128xf32>
    %24 = vector.broadcast %21 : vector<1x128xf32> to vector<4x128xf32>
    %25 = arith.mulf %24, %23 : vector<4x128xf32>
    %c0_15 = arith.constant 0 : index
    %c0_16 = arith.constant 0 : index
    %26 = vector.load %arg3[%c0_15, %c0_16] : memref<1x128xf32, #tpu.memory_space<vmem>>, vector<1x128xf32>
    %27 = vector.broadcast %26 : vector<1x128xf32> to vector<4x128xf32>
    %28 = arith.addf %25, %27 : vector<4x128xf32>
    %c0_17 = arith.constant 0 : index
    %c0_18 = arith.constant 0 : index
    %29 = vector.load %arg6[%c0_17, %c0_18] : memref<4x128xf32, #tpu.memory_space<vmem>>, vector<4x128xf32>
    tpu.vector_store %arg6[%c0_17, %c0_18], %28 {strides = array<i32>} : memref<4x128xf32, #tpu.memory_space<vmem>>, vector<4x128xf32>,
    return
  }
  func.func @transform_0(%arg0: i32) -> (i32, i32) {
    %c0_i32 = arith.constant 0 : i32
    %c0_i32_0 = arith.constant 0 : i32
    return %arg0, %c0_i32 : i32, i32
  }
  func.func @transform_1(%arg0: i32) -> (i32, i32) {
    %c0_i32 = arith.constant 0 : i32
    %c0_i32_0 = arith.constant 0 : i32
    %c0_i32_1 = arith.constant 0 : i32
    return %c0_i32, %c0_i32_0 : i32, i32
  }
  func.func @transform_2(%arg0: i32) -> (i32, i32) {
    %c0_i32 = arith.constant 0 : i32
    %c0_i32_0 = arith.constant 0 : i32
    %c0_i32_1 = arith.constant 0 : i32
    return %c0_i32, %c0_i32_0 : i32, i32
  }
  func.func @transform_3(%arg0: i32) -> (i32, i32) {
    %c0_i32 = arith.constant 0 : i32
    %c0_i32_0 = arith.constant 0 : i32
    %c0_i32_1 = arith.constant 0 : i32
    return %c0_i32, %c0_i32_0 : i32, i32
  }
  func.func @transform_4(%arg0: i32) -> (i32, i32) {
    %c0_i32 = arith.constant 0 : i32
    %c0_i32_0 = arith.constant 0 : i32
    %c0_i32_1 = arith.constant 0 : i32
    return %c0_i32, %c0_i32_0 : i32, i32
  }
  func.func @transform_5(%arg0: i32) -> (i32, i32) {
    %c0_i32 = arith.constant 0 : i32
    %c0_i32_0 = arith.constant 0 : i32
    return %arg0, %c0_i32 : i32, i32
  }
}

</mosaic_0001>

<bundles_post_ra>
// kernel: tpu_custom_call.1
= control target key start
LH: loop header
LB: loop body
LE: loop exit
PB: predicated region body
PF: predicated region fallthrough
CT: control target
= control target key end

     0   :  { %s1619_s0 = inlined_call_operand.vmem [shape: f32[4,128], index: 0, kind: input, shape index: {}]   ;;  %s1620_s1 = inlined_call_operand.vmem [shape: f32[1,128], index: 1, kind: input, shape index: {}]   ;;  %s1621_s2 = inlined_call_operand.vmem [shape: f32[1,128], index: 2, kind: input, shape index: {}]   ;;  %s1622_s3 = inlined_call_operand.vmem [shape: f32[128,4], index: 3, kind: input, shape index: {}]   ;;  %s1623_s4 = inlined_call_operand.vmem [shape: f32[4,128], index: 4, kind: input, shape index: {}]   ;;  %s1624_s5 = inlined_call_operand.hbm [shape: f32[4,128], index: 5, kind: output, shape index: {}]  }
   0x1   :  { %v37_v0 = vld [vmem:[%s1622_s3 + $0x78] sm:$0xff]  ;;  %v36_v1 = vld [vmem:[%s1622_s3 + $0x70] sm:$0xff]  ;;  %v35_v2 = vld [vmem:[%s1622_s3 + $0x68] sm:$0xff] }
   0x2   :  { %v1160_v3 = vand.u32 4294901760, %v37_v0  ;;  %v1162_v4 = vand.u32 4294901760, %v36_v1  ;;  %v1164_v5 = vand.u32 4294901760, %v35_v2  ;;  %v34_v6 = vld [vmem:[%s1622_s3 + $0x60] sm:$0xff]  ;;  %v33_v7 = vld [vmem:[%s1622_s3 + $0x58] sm:$0xff]  ;;  %v32_v8 = vld [vmem:[%s1622_s3 + $0x50] sm:$0xff] }
   0x3   :  { %v1175_v9 = vand.u32 4294901760, %v34_v6  ;;  %v1177_v10 = vand.u32 4294901760, %v33_v7  ;;  %v1179_v11 = vand.u32 4294901760, %v32_v8  ;;  %v31_v12 = vld [vmem:[%s1622_s3 + $0x48] sm:$0xff]  ;;  %v30_v13 = vld [vmem:[%s1622_s3 + $0x40] sm:$0xff]  ;;  %v29_v21 = vld [vmem:[%s1622_s3 + $0x38] sm:$0xff] }
   0x4   :  { %40 = vmatpush.msra.mxu0 %v1160_v3  ;;  %v1189_v14 = vsub.f32 %v37_v0, %v1160_v3  ;;  %v1192_v15 = vsub.f32 %v36_v1, %v1162_v4  ;;  %236 = vmatpush.msra.mxu3 %v1160_v3  ;;  %v1196_v16 = vsub.f32 %v35_v2, %v1164_v5  ;;  %v1198_v17 = vand.u32 4294901760, %v31_v12 }
   0x5   :  { %v1201_v18 = vsub.f32 %v34_v6, %v1175_v9  ;;  %v1204_v19 = vsub.f32 %v33_v7, %v1177_v10  ;;  %v1207_v20 = vsub.f32 %v32_v8, %v1179_v11  ;;  %v1223_v25 = vand.u32 4294901760, %v30_v13 }
   0x6   :  { %183 = vmatpush.msra.mxu2 %v1189_v14  ;;  %42 = vmatpush.msra.mxu0 %v1162_v4  ;;  %v1215_v22 = vand.u32 4294901760, %v1189_v14  ;;  %v1218_v23 = vand.u32 4294901760, %v1192_v15  ;;  %v1221_v24 = vand.u32 4294901760, %v1196_v16 }
   0x7   :  { %10 = vsyncpa [#allocation3], 0  ;;  %238 = vmatpush.msra.mxu3 %v1162_v4  ;;  %v1227_v26 = vand.u32 4294901760, %v1201_v18  ;;  %v1230_v27 = vand.u32 4294901760, %v1204_v19  ;;  %v1233_v28 = vsub.f32 %v31_v12, %v1198_v17  ;;  %v1243_v32 = vand.u32 4294901760, %v29_v21  ;;  %v28_v34 = vld [vmem:[%s1622_s3 + $0x30] sm:$0xff] }
   0x8   :  { %186 = vmatpush.msra.mxu2 %v1192_v15  ;;  %44 = vmatpush.msra.mxu0 %v1164_v5  ;;  %v83_v29 = vsub.f32 %v1189_v14, %v1215_v22  ;;  %v89_v30 = vsub.f32 %v1192_v15, %v1218_v23  ;;  %v95_v31 = vsub.f32 %v1196_v16, %v1221_v24  ;;  %v1247_v33 = vand.u32 4294901760, %v1207_v20  ;;  %v27_v35 = vld [vmem:[%s1622_s3 + $0x28] sm:$0xff]  ;;  %v26_v42 = vld [vmem:[%s1622_s3 + $0x20] sm:$0xff]  ;;  %v25_v48 = vld [vmem:[%s1622_s3 + $0x18] sm:$0xff]  ;;  %s1120_s30 = smov [#allocation2]   ;;  %s1078_s9 = sshll.u32 %s1624_s5, 4  ;;  %s1079_s9 = int_to_ptr.hbm [resolvable:$true] %s1078_s9 }
   0x9   :  { %240 = vmatpush.msra.mxu3 %v1164_v5  ;;  %v101_v38 = vsub.f32 %v1201_v18, %v1227_v26  ;;  %v1264_v39 = vsub.f32 %v30_v13, %v1223_v25  ;;  %v107_v40 = vsub.f32 %v1204_v19, %v1230_v27  ;;  %v1270_v41 = vand.u32 4294901760, %v1233_v28  ;;  %v24_v54 = vld [vmem:[%s1622_s3 + $0x10] sm:$0xff]  ;;  %v23_v60 = vld [vmem:[%s1622_s3 + $0x8] sm:$0xff]  ;;  %v22_v1 = vld [vmem:[%s1622_s3] sm:$0xff]  ;;  %s1076_s6 = sshll.u32 %s1120_s30, 4  ;;  %s1077_s6 = int_to_ptr.vmem [resolvable:$true] %s1076_s6 }
   0xa   :  { %v1255_v36 = vand.u32 4294901760, %v83_v29  ;;  %189 = vmatpush.msra.mxu2 %v1196_v16  ;;  %46 = vmatpush.msra.mxu0 %v1175_v9  ;;  %v1259_v37 = vand.u32 4294901760, %v89_v30  ;;  %v1277_v43 = vand.u32 4294901760, %v95_v31  ;;  %v1280_v44 = vsub.f32 %v29_v21, %v1243_v32 }
   0xb   :  { %242 = vmatpush.msra.mxu3 %v1175_v9  ;;  %v1282_v45 = vand.u32 4294901760, %v28_v34  ;;  %v1284_v46 = vand.u32 4294901760, %v27_v35  ;;  %v113_v47 = vsub.f32 %v1207_v20, %v1247_v33  ;;  %v1295_v49 = vand.u32 4294901760, %v101_v38 }
   0xc   :  { %85 = vmatpush.msra.mxu1 %v1255_v36  ;;  %192 = vmatpush.msra.mxu2 %v1201_v18  ;;  %v1298_v50 = vand.u32 4294901760, %v1264_v39  ;;  %v1303_v52 = vand.u32 4294901760, %v26_v42  ;;  %v119_v53 = vsub.f32 %v1233_v28, %v1270_v41  ;;  %v1314_v55 = vand.u32 4294901760, %v107_v40 }
   0xd   :  { %48 = vmatpush.msra.mxu0 %v1177_v10  ;;  %244 = vmatpush.msra.mxu3 %v1177_v10  ;;  %v1301_v51 = vsub.f32 %v28_v34, %v1282_v45  ;;  %v1317_v56 = vand.u32 4294901760, %v1280_v44  ;;  %v1320_v57 = vsub.f32 %v27_v35, %v1284_v46  ;;  %v1322_v58 = vand.u32 4294901760, %v25_v48 }
   0xe   :  { %91 = vmatpush.msra.mxu1 %v1259_v37  ;;  %195 = vmatpush.msra.mxu2 %v1204_v19  ;;  %v1325_v59 = vand.u32 4294901760, %v113_v47  ;;  %v125_v61 = vsub.f32 %v1264_v39, %v1298_v50  ;;  %v1339_v63 = vsub.f32 %v26_v42, %v1303_v52  ;;  %v1341_v0 = vand.u32 4294901760, %v24_v54 }
   0xf   :  { %50 = vmatpush.msra.mxu0 %v1179_v11  ;;  %246 = vmatpush.msra.mxu3 %v1179_v11  ;;  %v1336_v62 = vand.u32 4294901760, %v1301_v51  ;;  %v1347_v2 = vand.u32 4294901760, %v119_v53  ;;  %v131_v6 = vsub.f32 %v1280_v44, %v1317_v56  ;;  %v1355_v7 = vand.u32 4294901760, %v1320_v57 }
  0x10   :  { %97 = vmatpush.msra.mxu1 %v1277_v43  ;;  %198 = vmatpush.msra.mxu2 %v1207_v20  ;;  %1627 = vst [vmem:[#allocation5_spill] sm:$0xff] %v1339_v63  ;;  %v1358_v8 = vsub.f32 %v25_v48, %v1322_v58  ;;  %v1360_v12 = vand.u32 4294901760, %v23_v60  ;;  %v1364_v13 = vand.u32 4294901760, %v22_v1  ;;  %v1368_v21 = vand.u32 4294901760, %v125_v61 }
  0x11   :  { %52 = vmatpush.msra.mxu0 %v1198_v17  ;;  %248 = vmatpush.msra.mxu3 %v1198_v17  ;;  %v137_v29 = vsub.f32 %v1301_v51, %v1336_v62  ;;  %v1373_v30 = vand.u32 4294901760, %v1339_v63  ;;  %v1376_v31 = vsub.f32 %v24_v54, %v1341_v0  ;;  %v1382_v34 = vand.u32 4294901760, %v131_v6 }
  0x12   :  { %103 = vmatpush.msra.mxu1 %v1295_v49  ;;  %201 = vmatpush.msra.mxu2 %v1233_v28  ;;  %1628 = vst [vmem:[#allocation6_spill] sm:$0xff] %v1358_v8  ;;  %v143_v35 = vsub.f32 %v1320_v57, %v1355_v7  ;;  %v1387_v38 = vand.u32 4294901760, %v1358_v8  ;;  %v1390_v40 = vsub.f32 %v23_v60, %v1360_v12  ;;  %vm759_vm0 = vcmask 1043456  }
  0x13   :  { %54 = vmatpush.msra.mxu0 %v1223_v25  ;;  %250 = vmatpush.msra.mxu3 %v1223_v25  ;;  %v1396_v42 = vand.u32 4294901760, %v137_v29  ;;  %v149_v47 = vsub.f32 %v1339_v63, %v1373_v30  ;;  %v1401_v48 = vand.u32 4294901760, %v1376_v31  ;;  %v1404_v53 = vsub.f32 %v22_v1, %v1364_v13 }
  0x14   :  { %109 = vmatpush.msra.mxu1 %v1314_v55  ;;  %204 = vmatpush.msra.mxu2 %v1264_v39  ;;  %v1410_v54 = vand.u32 4294901760, %v143_v35  ;;  %v155_v60 = vsub.f32 %v1358_v8, %v1387_v38  ;;  %v1415_v61 = vand.u32 4294901760, %v1390_v40  ;;  %vm755_vm1 = vcmask 31744  }
  0x15   :  { %56 = vmatpush.msra.mxu0 %v1243_v32  ;;  %252 = vmatpush.msra.mxu3 %v1243_v32  ;;  %v1421_v1 = vand.u32 4294901760, %v149_v47  ;;  %v161_v6 = vsub.f32 %v1376_v31, %v1401_v48  ;;  %v1426_v29 = vand.u32 4294901760, %v1404_v53 }
  0x16   :  { %115 = vmatpush.msra.mxu1 %v1325_v59  ;;  %207 = vmatpush.msra.mxu2 %v1280_v44  ;;  %v1432_v35 = vand.u32 4294901760, %v155_v60  ;;  %v167_v47 = vsub.f32 %v1390_v40, %v1415_v61 }
  0x17   :  { %58 = vmatpush.msra.mxu0 %v1282_v45  ;;  %254 = vmatpush.msra.mxu3 %v1282_v45 }
  0x18   :  { %121 = vmatpush.msra.mxu1 %v1347_v2  ;;  %210 = vmatpush.msra.mxu2 %v1301_v51  ;;  %v1448_v60 = vand.u32 4294901760, %v167_v47  ;;  %v1463_v47 = vld [vmem:[%s1619_s0] sm:$0xf] }
  0x19   :  { %60 = vmatpush.msra.mxu0 %v1284_v46  ;;  %256 = vmatpush.msra.mxu3 %v1284_v46 }
  0x1a   :  { %127 = vmatpush.msra.mxu1 %v1368_v21  ;;  %213 = vmatpush.msra.mxu2 %v1320_v57 }
  0x1b   :  { %62 = vmatpush.msra.mxu0 %v1303_v52  ;;  %258 = vmatpush.msra.mxu3 %v1303_v52 }
  0x1c   :  { %133 = vmatpush.msra.mxu1 %v1382_v34  ;;  %216 = vmatpush.msra.mxu2 %v1339_v63  ;;  %v173_v63 = vsub.f32 %v1404_v53, %v1426_v29 }
  0x1d   :  { %64 = vmatpush.msra.mxu0 %v1322_v58  ;;  %260 = vmatpush.msra.mxu3 %v1322_v58 }
  0x1e   :  { %139 = vmatpush.msra.mxu1 %v1396_v42  ;;  %219 = vmatpush.msra.mxu2 %v1358_v8  ;;  %v1440_v8 = vand.u32 4294901760, %v161_v6  ;;  %v1454_v6 = vand.u32 4294901760, %v173_v63 }
  0x1f   :  { %66 = vmatpush.msra.mxu0 %v1341_v0  ;;  %262 = vmatpush.msra.mxu3 %v1341_v0 }
  0x20   :  { %145 = vmatpush.msra.mxu1 %v1410_v54  ;;  %222 = vmatpush.msra.mxu2 %v1376_v31 }
  0x21   :  { %68 = vmatpush.msra.mxu0 %v1360_v12  ;;  %264 = vmatpush.msra.mxu3 %v1360_v12 }
  0x22   :  { %151 = vmatpush.msra.mxu1 %v1421_v1  ;;  %225 = vmatpush.msra.mxu2 %v1390_v40 }
  0x23   :  { %70 = vmatpush.msra.mxu0 %v1364_v13  ;;  %266 = vmatpush.msra.mxu3 %v1364_v13 }
  0x24   :  { %157 = vmatpush.msra.mxu1 %v1432_v35  ;;  %228 = vmatpush.msra.mxu2 %v1404_v53 }
  0x25   :  { %277 = vmatpush.msrb.mxu0 %v1215_v22  ;;  %427 = vmatpush.msrb.mxu3 %v1255_v36  ;;  %v1472_v36 = vand.u32 4294901760, %v1463_v47 }
  0x26   :  { %382 = vmatpush.msrb.mxu2 %v1160_v3  ;;  %163 = vmatpush.msra.mxu1 %v1440_v8 }
  0x27   :  { %281 = vmatpush.msrb.mxu0 %v1218_v23  ;;  %433 = vmatpush.msrb.mxu3 %v1259_v37  ;;  %v72_v37 = vsub.f32 %v1463_v47, %v1472_v36 }
  0x28   :  { %384 = vmatpush.msrb.mxu2 %v1162_v4  ;;  %169 = vmatpush.msra.mxu1 %v1448_v60 }
  0x29   :  { %285 = vmatpush.msrb.mxu0 %v1221_v24  ;;  %439 = vmatpush.msrb.mxu3 %v1277_v43  ;;  %v73_v43 = vand.u32 4294901760, %v72_v37 }
  0x2a   :  { %386 = vmatpush.msrb.mxu2 %v1164_v5  ;;  %175 = vmatpush.msra.mxu1 %v1454_v6 }
  0x2b   :  { %289 = vmatpush.msrb.mxu0 %v1227_v26  ;;  %445 = vmatpush.msrb.mxu3 %v1295_v49  ;;  %v74_v49 = vsub.f32 %v72_v37, %v73_v43 }
  0x2c   :  { %344 = vmatpush.msrb.mxu1 %v1160_v3  ;;  %388 = vmatpush.msrb.mxu2 %v1175_v9 }
  0x2d   :  { %293 = vmatpush.msrb.mxu0 %v1230_v27  ;;  %451 = vmatpush.msrb.mxu3 %v1314_v55  ;;  %v75_v55 = vand.u32 4294901760, %v74_v49 }
  0x2e   :  { %346 = vmatpush.msrb.mxu1 %v1162_v4  ;;  %390 = vmatpush.msrb.mxu2 %v1177_v10 }
  0x2f   :  { %297 = vmatpush.msrb.mxu0 %v1247_v33  ;;  %457 = vmatpush.msrb.mxu3 %v1325_v59  ;;  %v380_v59 = vmul.f32 %v1463_v47, %v1463_v47 }
  0x30   :  { %348 = vmatpush.msrb.mxu1 %v1164_v5  ;;  %392 = vmatpush.msrb.mxu2 %v1179_v11 }
  0x31   :  { %301 = vmatpush.msrb.mxu0 %v1270_v41  ;;  %463 = vmatpush.msrb.mxu3 %v1347_v2 }
  0x32   :  { %350 = vmatpush.msrb.mxu1 %v1175_v9  ;;  %394 = vmatpush.msrb.mxu2 %v1198_v17 }
  0x33   :  { %305 = vmatpush.msrb.mxu0 %v1298_v50  ;;  %469 = vmatpush.msrb.mxu3 %v1368_v21 }
  0x34   :  { %352 = vmatpush.msrb.mxu1 %v1177_v10  ;;  %396 = vmatpush.msrb.mxu2 %v1223_v25 }
  0x35   :  { %309 = vmatpush.msrb.mxu0 %v1317_v56  ;;  %475 = vmatpush.msrb.mxu3 %v1382_v34 }
  0x36   :  { %354 = vmatpush.msrb.mxu1 %v1179_v11  ;;  %398 = vmatpush.msrb.mxu2 %v1243_v32 }
  0x37   :  { %313 = vmatpush.msrb.mxu0 %v1336_v62  ;;  %481 = vmatpush.msrb.mxu3 %v1396_v42 }
  0x38   :  { %356 = vmatpush.msrb.mxu1 %v1198_v17  ;;  %400 = vmatpush.msrb.mxu2 %v1282_v45 }
  0x39   :  { %317 = vmatpush.msrb.mxu0 %v1355_v7  ;;  %487 = vmatpush.msrb.mxu3 %v1410_v54 }
  0x3a   :  { %358 = vmatpush.msrb.mxu1 %v1223_v25  ;;  %402 = vmatpush.msrb.mxu2 %v1284_v46 }
  0x3b   :  { %321 = vmatpush.msrb.mxu0 %v1373_v30  ;;  %493 = vmatpush.msrb.mxu3 %v1421_v1 }
  0x3c   :  { %360 = vmatpush.msrb.mxu1 %v1243_v32  ;;  %404 = vmatpush.msrb.mxu2 %v1303_v52 }
  0x3d   :  { %231 = vmatmul.f32.vlgmr.msra.gmra.mxu2 %v72_v37  ;;  %325 = vmatpush.msrb.mxu0 %v1387_v38 }
  0x3e   :  { %362 = vmatpush.msrb.mxu1 %v1282_v45  ;;  %406 = vmatpush.msrb.mxu2 %v1322_v58 }
  0x3f   :  { %76 = vmatmul.f32.vlgmr.msra.gmra.mxu0 %v75_v55  ;;  %270 = vmatmul.f32.vlgmr.msra.gmra.mxu3 %v73_v43 }
  0x40   :  { %364 = vmatpush.msrb.mxu1 %v1284_v46  ;;  %329 = vmatpush.msrb.mxu0 %v1401_v48 }
  0x41   :  { %408 = vmatpush.msrb.mxu2 %v1341_v0  ;;  %499 = vmatpush.msrb.mxu3 %v1432_v35 }
  0x42   :  { %366 = vmatpush.msrb.mxu1 %v1303_v52  ;;  %333 = vmatpush.msrb.mxu0 %v1415_v61 }
  0x43   :  { %177 = vmatmul.f32.vlgmr.msra.gmra.mxu1 %v1472_v36  ;;  %410 = vmatpush.msrb.mxu2 %v1360_v12 }
  0x44   :  { %368 = vmatpush.msrb.mxu1 %v1322_v58  ;;  %505 = vmatpush.msrb.mxu3 %v1440_v8 }
  0x45   :  { %337 = vmatpush.msrb.mxu0 %v1426_v29  ;;  %412 = vmatpush.msrb.mxu2 %v1364_v13 }
  0x46   :  { %370 = vmatpush.msrb.mxu1 %v1341_v0  ;;  %511 = vmatpush.msrb.mxu3 %v1448_v60 }
  0x47   :  { %525 = vmatpush.msra.mxu0 %v1189_v14  ;;  %619 = vmatpush.msra.mxu2 %v1215_v22  ;;  %v1541_v14 = vand.u32 4294901760, %v380_v59 }
  0x48   :  { %372 = vmatpush.msrb.mxu1 %v1360_v12  ;;  %517 = vmatpush.msrb.mxu3 %v1454_v6 }
  0x49   :  { %339 = vmatmul.f32.vlgmr.msrb.gmra.mxu0 %v1472_v36  ;;  %623 = vmatpush.msra.mxu2 %v1218_v23 }
  0x4a   :  { %528 = vmatpush.msra.mxu0 %v1192_v15  ;;  %686 = vmatpush.msra.mxu3 %v1160_v3  ;;  %v414_v15 = vsub.f32 %v380_v59, %v1541_v14 }
  0x4b   :  { %374 = vmatpush.msrb.mxu1 %v1364_v13  ;;  %627 = vmatpush.msra.mxu2 %v1221_v24 }
  0x4c   :  { %376 = vmatmul.f32.vlgmr.msrb.gmra.mxu1 %v1472_v36  ;;  %531 = vmatpush.msra.mxu0 %v1196_v16 }
  0x4d   :  { %578 = vmatpush.msra.mxu1 %v1160_v3  ;;  %688 = vmatpush.msra.mxu3 %v1162_v4  ;;  %v415_v3 = vand.u32 4294901760, %v414_v15 }
  0x4e   :  { %534 = vmatpush.msra.mxu0 %v1201_v18  ;;  %631 = vmatpush.msra.mxu2 %v1227_v26 }
  0x4f   :  { %580 = vmatpush.msra.mxu1 %v1162_v4  ;;  %690 = vmatpush.msra.mxu3 %v1164_v5  ;;  %v416_v4 = vsub.f32 %v414_v15, %v415_v3 }
  0x50   :  { %537 = vmatpush.msra.mxu0 %v1204_v19  ;;  %635 = vmatpush.msra.mxu2 %v1230_v27 }
  0x51   :  { %582 = vmatpush.msra.mxu1 %v1164_v5  ;;  %692 = vmatpush.msra.mxu3 %v1175_v9  ;;  %v417_v5 = vand.u32 4294901760, %v416_v4 }
  0x52   :  { %540 = vmatpush.msra.mxu0 %v1207_v20  ;;  %639 = vmatpush.msra.mxu2 %v1247_v33 }
  0x53   :  { %584 = vmatpush.msra.mxu1 %v1175_v9  ;;  %694 = vmatpush.msra.mxu3 %v1177_v10  ;;  %v1629_v9 = vld [vmem:[#allocation5_spill] sm:$0xff] }
  0x54   :  { %543 = vmatpush.msra.mxu0 %v1233_v28  ;;  %643 = vmatpush.msra.mxu2 %v1270_v41 }
  0x55   :  { %586 = vmatpush.msra.mxu1 %v1177_v10  ;;  %696 = vmatpush.msra.mxu3 %v1179_v11  ;;  %v1630_v10 = vld [vmem:[#allocation6_spill] sm:$0xff] }
  0x56   :  { %546 = vmatpush.msra.mxu0 %v1264_v39  ;;  %647 = vmatpush.msra.mxu2 %v1298_v50 }
  0x57   :  { %588 = vmatpush.msra.mxu1 %v1179_v11  ;;  %698 = vmatpush.msra.mxu3 %v1198_v17  ;;  %v38_v11 = vld [vmem:[%s1623_s4] sm:$0xf] }
  0x58   :  { %549 = vmatpush.msra.mxu0 %v1280_v44  ;;  %651 = vmatpush.msra.mxu2 %v1317_v56  ;;  %v761_v16 = vsel %vm759_vm0, %v38_v11, 0 }
  0x59   :  { %590 = vmatpush.msra.mxu1 %v1198_v17  ;;  %700 = vmatpush.msra.mxu3 %v1223_v25  ;;  %v778_v17 = vand.u32 4294901760, %v761_v16 }
  0x5a   :  { %552 = vmatpush.msra.mxu0 %v1301_v51  ;;  %655 = vmatpush.msra.mxu2 %v1336_v62 }
  0x5b   :  { %592 = vmatpush.msra.mxu1 %v1223_v25  ;;  %702 = vmatpush.msra.mxu3 %v1243_v32  ;;  %v805_v18 = vsub.f32 %v761_v16, %v778_v17 }
  0x5c   :  { %555 = vmatpush.msra.mxu0 %v1320_v57  ;;  %659 = vmatpush.msra.mxu2 %v1355_v7 }
  0x5d   :  { %594 = vmatpush.msra.mxu1 %v1243_v32  ;;  %704 = vmatpush.msra.mxu3 %v1282_v45  ;;  %v806_v19 = vand.u32 4294901760, %v805_v18 }
  0x5e   :  { %558 = vmatpush.msra.mxu0 %v1629_v9  ;;  %663 = vmatpush.msra.mxu2 %v1373_v30 }
  0x5f   :  { %596 = vmatpush.msra.mxu1 %v1282_v45  ;;  %706 = vmatpush.msra.mxu3 %v1284_v46  ;;  %v807_v20 = vsub.f32 %v805_v18, %v806_v19 }
  0x60   :  { %418 = vmatmul.f32.vlgmr.msrb.gmra.mxu2 %v417_v5  ;;  %519 = vmatmul.f32.vlgmr.msrb.gmra.mxu3 %v1541_v14 }
  0x61   :  { %561 = vmatpush.msra.mxu0 %v1630_v10  ;;  %598 = vmatpush.msra.mxu1 %v1284_v46  ;;  %v808_v22 = vand.u32 4294901760, %v807_v20 }
  0x62   :  { %667 = vmatpush.msra.mxu2 %v1387_v38  ;;  %708 = vmatpush.msra.mxu3 %v1303_v52 }
  0x63   :  { %564 = vmatpush.msra.mxu0 %v1376_v31  ;;  %600 = vmatpush.msra.mxu1 %v1303_v52 }
  0x64   :  { %671 = vmatpush.msra.mxu2 %v1401_v48  ;;  %710 = vmatpush.msra.mxu3 %v1322_v58 }
  0x65   :  { %567 = vmatpush.msra.mxu0 %v1390_v40  ;;  %602 = vmatpush.msra.mxu1 %v1322_v58 }
  0x66   :  { %675 = vmatpush.msra.mxu2 %v1415_v61  ;;  %712 = vmatpush.msra.mxu3 %v1341_v0 }
  0x67   :  { %570 = vmatpush.msra.mxu0 %v1404_v53  ;;  %604 = vmatpush.msra.mxu1 %v1341_v0 }
  0x68   :  { %679 = vmatpush.msra.mxu2 %v1426_v29  ;;  %714 = vmatpush.msra.mxu3 %v1360_v12 }
  0x69   :  { %573 = vmatmul.f32.vlgmr.msra.gmra.mxu0 %v414_v15  ;;  %681 = vmatmul.f32.vlgmr.msra.gmra.mxu2 %v1541_v14 }
  0x6a   :  { %606 = vmatpush.msra.mxu1 %v1360_v12  ;;  %716 = vmatpush.msra.mxu3 %v1364_v13 }
  0x6b   :  { %718 = vmatmul.f32.vlgmr.msra.gmra.mxu3 %v1541_v14  ;;  %779 = vmatpush.msrb.mxu0 %v778_v17 }
  0x6c   :  { %608 = vmatpush.msra.mxu1 %v1364_v13  ;;  %855 = vmatpush.msrb.mxu3 %v778_v17 }
  0x6d   :  { %612 = vmatmul.f32.vlgmr.msra.gmra.mxu1 %v415_v3  ;;  %832 = vmatpush.msrb.mxu2 %v805_v18 }
  0x6e   :  { %881 = vmatpush.msra.mxu0 %v806_v19  ;;  %809 = vmatpush.msrb.mxu1 %v808_v22 }
  0x6f   :  { %928 = vmatpush.msra.mxu2 %v778_v17  ;;  %958 = vmatpush.msra.mxu3 %v808_v22 }
  0x70   :  { %903 = vmatpush.msra.mxu1 %v778_v17 }
  0xbc   :  { %v77_v23 = vpop.f32.mrf.mxu0 }
  0xc0   :  { %v178_v24 = vpop.f32.mrf.mxu1  ;;  %v232_v26 = vpop.f32.mrf.mxu2 }
  0xc1   :  { %v179_v25 = vadd.f32 %v178_v24, %v77_v23 }
  0xc2   :  { %v271_v28 = vpop.f32.mrf.mxu3 }
  0xc3   :  { %v233_v27 = vadd.f32 %v232_v26, %v179_v25 }
  0xc5   :  { %v272_v32 = vadd.f32 %v271_v28, %v233_v27 }
  0xc6   :  { %v340_v33 = vpop.f32.mrf.mxu0 }
  0xc7   :  { %v341_v39 = vadd.f32 %v340_v33, %v272_v32 }
  0xc9   :  { %v377_v41 = vpop.f32.mrf.mxu1 }
  0xca   :  { %v378_v44 = vadd.f32 %v377_v41, %v341_v39 }
  0xcc   :  { %v722_v45 = vmul.f32 0.03125, %v378_v44 }
  0xce   :  { %v757_v46 = vsel %vm755_vm1, %v722_v45, 0  ;;  %v723_v30 = vmul.f32 %v722_v45, %v378_v44 }
  0xcf   :  { %v780_v50 = vand.u32 4294901760, %v757_v46 }
  0xd1   :  { %v781_v51 = vsub.f32 %v757_v46, %v780_v50  ;;  %811 = vmatmul.f32.vlgmr.msrb.gmra.mxu1 %v780_v50 }
  0xd2   :  { %1004 = vmatpush.msrb.mxu1 %v778_v17 }
  0xd3   :  { %835 = vmatmul.f32.vlgmr.msrb.gmra.mxu2 %v781_v51  ;;  %v782_v52 = vand.u32 4294901760, %v781_v51 }
  0xd4   :  { %1030 = vmatpush.msrb.mxu2 %v806_v19 }
  0xd5   :  { %859 = vmatmul.f32.vlgmr.msrb.gmra.mxu3 %v782_v52  ;;  %v783_v56 = vsub.f32 %v781_v51, %v782_v52 }
  0xd6   :  { %1052 = vmatpush.msrb.mxu3 %v778_v17 }
  0xd7   :  { %v784_v57 = vand.u32 4294901760, %v783_v56 }
  0xd9   :  { %785 = vmatmul.f32.vlgmr.msrb.gmra.mxu0 %v784_v57  ;;  %905 = vmatmul.f32.vlgmr.msra.gmra.mxu1 %v780_v50 }
  0xda   :  { %981 = vmatpush.msrb.mxu0 %v805_v18 }
  0xe1   :  { %883 = vmatmul.f32.vlgmr.msra.gmra.mxu0 %v780_v50 }
  0xe3   :  { %v419_v58 = vpop.f32.mrf.mxu2  ;;  %v520_v62 = vpop.f32.mrf.mxu3 }
  0xe4   :  { %v521_v63 = vadd.f32 %v520_v62, %v419_v58 }
  0xe6   :  { %v574_v0 = vpop.f32.mrf.mxu0 }
  0xe7   :  { %v575_v2 = vadd.f32 %v574_v0, %v521_v63  ;;  %v1088_v63 = vld [vmem:[%s1620_s1] ss:$0 sm:$0xff] }
  0xea   :  { %v613_v7 = vpop.f32.mrf.mxu1 }
  0xeb   :  { %v614_v8 = vadd.f32 %v613_v7, %v575_v2  ;;  %v1089_v2 = vld [vmem:[%s1621_s2] ss:$0 sm:$0xff] }
  0xec   :  { %v682_v12 = vpop.f32.mrf.mxu2 }
  0xed   :  { %v683_v13 = vadd.f32 %v682_v12, %v614_v8 }
  0xee   :  { %v719_v21 = vpop.f32.mrf.mxu3 }
  0xef   :  { %v720_v31 = vadd.f32 %v719_v21, %v683_v13 }
  0xf1   :  { %v724_v34 = vsub.f32 %v720_v31, %v723_v30 }
  0xf3   :  { %v725_v38 = vmax.f32 %v724_v34, 0.0 }
  0xf5   :  { %v726_v40 = vmul.f32 0.032258064, %v725_v38 }
  0xf7   :  { %1090 = vrsqrt.f32 %v726_v40  ;;  %vm734_vm2 = vcmp.eq.f32.partialorder %v726_v40, inf  ;;  %v737_v35 = vand.u32 2147483648, %v726_v40  ;;  %vm736_vm3 = vcmp.eq.f32.partialorder %v726_v40, 0.0 }
  0xfd   :  { %v1091_v42 = vpop.eup %1090 }
  0xfe   :  { %v728_v48 = vmul.f32 %v1091_v42, %v726_v40 }
 0x100   :  { %v729_v53 = vmul.f32 %v1091_v42, %v728_v48 }
 0x102   :  { %v730_v54 = vmul.f32 0.5, %v729_v53 }
 0x104   :  { %v731_v61 = vsub.f32 1.5, %v730_v54 }
 0x106   :  { %v732_v1 = vmul.f32 %v1091_v42, %v731_v61 }
 0x108   :  { %v733_v29 = vmul.f32 %v732_v1, %v726_v40 }
 0x10a   :  { %v735_v60 = vsel %vm734_vm2, %v726_v40, %v733_v29 }
 0x10b   :  { %v738_v6 = vsel %vm736_vm3, %v737_v35, %v735_v60 }
 0x10c   :  { %v739_v36 = vadd.f32 1e-09, %v738_v6 }
 0x10e   :  { %1092 = vrcp.f32 %v739_v36  ;;  %v751_v55 = vand.u32 2147483648, %v739_v36  ;;  %v749_v14 = vand.u32 2147483647, %v739_v36  ;;  %vm745_vm5 = vweird.f32 %v739_v36 }
 0x110   :  { %v752_v3 = vor.u32 1.1754944e-38, %v751_v55  ;;  %vm750_vm7 = vcmp.eq.f32.partialorder %v749_v14, 8.507059e+37 }
 0x114   :  { %v1093_v37 = vpop.eup %1092 }
 0x115   :  { %v741_v43 = vmul.f32 %v1093_v37, %v739_v36  ;;  %vm746_vm4 = vweird.f32 %v1093_v37 }
 0x116   :  { %vm747_vm6 = vmor %vm745_vm5, %vm746_vm4 }
 0x117   :  { %v742_v49 = vsub.f32 1.0, %v741_v43 }
 0x119   :  { %v743_v59 = vmul.f32 %v1093_v37, %v742_v49 }
 0x11b   :  { %v744_v15 = vadd.f32 %v1093_v37, %v743_v59 }
 0x11d   :  { %v748_v4 = vsel %vm747_vm6, %v1093_v37, %v744_v15 }
 0x11e   :  { %v753_v5 = vsel %vm750_vm7, %v752_v3, %v748_v4 }
 0x11f   :  { %v910_v9 = vsel %vm755_vm1, %v753_v5, 0 }
 0x120   :  { %v929_v10 = vand.u32 4294901760, %v910_v9 }
 0x122   :  { %960 = vmatmul.f32.vlgmr.msra.gmra.mxu3 %v929_v10  ;;  %v930_v11 = vsub.f32 %v910_v9, %v929_v10 }
 0x124   :  { %984 = vmatmul.f32.vlgmr.msrb.gmra.mxu0 %v930_v11  ;;  %v931_v16 = vand.u32 4294901760, %v930_v11 }
 0x126   :  { %1008 = vmatmul.f32.vlgmr.msrb.gmra.mxu1 %v931_v16  ;;  %v932_v17 = vsub.f32 %v930_v11, %v931_v16 }
 0x128   :  { %v933_v18 = vand.u32 4294901760, %v932_v17 }
 0x12a   :  { %934 = vmatmul.f32.vlgmr.msra.gmra.mxu2 %v933_v18  ;;  %1054 = vmatmul.f32.vlgmr.msrb.gmra.mxu3 %v929_v10 }
 0x132   :  { %1032 = vmatmul.f32.vlgmr.msrb.gmra.mxu2 %v929_v10 }
 0x14e   :  { %v812_v20 = vpop.f32.mrf.mxu1 }
 0x156   :  { %v786_v19 = vpop.f32.mrf.mxu0  ;;  %v836_v22 = vpop.f32.mrf.mxu2 }
 0x157   :  { %v813_v24 = vadd.f32 %v812_v20, %v786_v19  ;;  %v906_v27 = vpop.f32.mrf.mxu1 }
 0x158   :  { %v860_v23 = vpop.f32.mrf.mxu3 }
 0x159   :  { %v837_v26 = vadd.f32 %v836_v22, %v813_v24 }
 0x15b   :  { %v861_v33 = vadd.f32 %v860_v23, %v837_v26 }
 0x15e   :  { %v884_v25 = vpop.f32.mrf.mxu0 }
 0x15f   :  { %v885_v44 = vadd.f32 %v884_v25, %v861_v33 }
 0x161   :  { %v907_v50 = vadd.f32 %v906_v27, %v885_v44 }
 0x163   :  { %v1059_v58 = vsub.f32 %v1463_v47, %v907_v50 }
 0x1a1   :  { %v985_v41 = vpop.f32.mrf.mxu0 }
 0x1a3   :  { %v1009_v46 = vpop.f32.mrf.mxu1 }
 0x1a5   :  { %v961_v28 = vpop.f32.mrf.mxu3 }
 0x1ad   :  { %v935_v32 = vpop.f32.mrf.mxu2  ;;  %v1055_v57 = vpop.f32.mrf.mxu3 }
 0x1ae   :  { %v962_v39 = vadd.f32 %v961_v28, %v935_v32 }
 0x1b0   :  { %v986_v45 = vadd.f32 %v985_v41, %v962_v39 }
 0x1b2   :  { %v1010_v51 = vadd.f32 %v1009_v46, %v986_v45 }
 0x1b5   :  { %v1033_v52 = vpop.f32.mrf.mxu2 }
 0x1b6   :  { %v1034_v56 = vadd.f32 %v1033_v52, %v1010_v51 }
 0x1b8   :  { %v1056_v62 = vadd.f32 %v1055_v57, %v1034_v56 }
 0x1ba   :  { %v1060_v0 = vmul.f32 %v1059_v58, %v1056_v62 }
 0x1bc   :  { %v1064_v7 = vmul.f32 %v1088_v63, %v1060_v0 }
 0x1be   :  { %v1069_v8 = vadd.f32 %v1089_v2, %v1064_v7 }
 0x1c0   :  { %1070 = vst [vmem:[#allocation2] sm:$0xf] %v1069_v8 }
 0x1c1   :  { %1081 = dma.vmem_to_hbm [thread:$0]  %s1077_s6, 64, %s1079_s9, [#allocation3]  }
 0x1c2   :  { %1118 = dma.done.wait [#allocation3], 64  }
 0x1c3   :  { %1119 = vsyncadd [#allocation3], 4294967232 }
 0x1c4   :  { %1086 = vsyncpa [#allocation3], 1 }

</bundles_post_ra>
